<compile_context>
chip_gen: v6e
topology: v6e:2x2x1
jax: 0.10.0
libtpu: 0.0.40
codegen_flags: <defaults>
</compile_context>

<pallas_src>
import jax
import jax.numpy as jnp
from jax import lax
from jax.experimental import pallas as pl
from jax.experimental.pallas import tpu as pltpu


def critic_kernel(x_ref, w1t_ref, b1t_ref, w2t_ref, b2t_ref, w3t_ref, b3_ref, o_ref):
    # x block: (tb, n_state). Compute in transposed (batch-on-lanes) form.
    # h1ᵀ = W1ᵀ · xᵀ : contract w1t dim 1 (n_state) with x dim 1 (n_state) -> (hidden, tb)
    h1t = lax.dot_general(
        w1t_ref[...], x_ref[...],
        dimension_numbers=(((1,), (1,)), ((), ())),
        preferred_element_type=jnp.float32,
    )
    h1t = jnp.maximum(h1t + b1t_ref[...], 0.0)                     # (hidden, tb), lane-dense
    # h2ᵀ = W2ᵀ · h1ᵀ -> (hidden, tb)
    h2t = jnp.dot(w2t_ref[...], h1t, preferred_element_type=jnp.float32)
    h2t = jnp.maximum(h2t + b2t_ref[...], 0.0)
    # value head: (1, hidden) · (hidden, tb) -> (1, tb), lane-dense output slab
    v = jnp.dot(w3t_ref[...], h2t, preferred_element_type=jnp.float32)
    # b3 is a scalar in SMEM -> scalar-path add, no padded VMEM tile.
    o_ref[...] = (v + b3_ref[0]).astype(o_ref.dtype)


def _round_up(x, m):
    return ((x + m - 1) // m) * m


def critic_forward(x, params, *, block_batch=None):
    w1, b1, w2, b2, w3, b3 = params
    batch, n_state = x.shape
    hidden = w1.shape[1]

    # Batch tile selection:
    #   * batch <= 1024: single block (lowest overhead; right call on 1-TC v5e/v6e).
    #   * batch  > 1024: >= 2 grid steps so both v7x TensorCores get work, tile is a
    #     multiple of 128 (unmasked lane-dense stores), capped at 4096 rows
    #     (~300 KB/step — three orders of magnitude under any generation's VMEM).
    if block_batch is None:
        if batch <= 1024:
            block_batch = batch
        else:
            block_batch = min(4096, _round_up(pl.cdiv(batch, 2), 128))
    tb = int(block_batch)
    if tb >= batch:
        tb = batch
    else:
        assert tb % 128 == 0, "batch tile must be a multiple of 128 when tiling"
    grid = (pl.cdiv(batch, tb),)

    # Transposed weight/bias views for the batch-on-lanes layout (tiny, one-time).
    w1t = w1.T                              # (hidden, n_state)
    w2t = w2.T                              # (hidden, hidden)
    b1t = b1.reshape(hidden, 1)
    b2t = b2.reshape(hidden, 1)
    w3t = w3.reshape(1, hidden)
    b3s = b3.reshape(-1).astype(jnp.float32)

    def resident(shape):
        # Whole array, same block index every grid step -> stays resident in VMEM,
        # no per-step re-DMA.
        return pl.BlockSpec(shape, lambda i: (0,) * len(shape))

    flops = 2 * batch * (n_state * hidden + hidden * hidden + hidden)
    bytes_accessed = 4 * (x.size + w1.size + b1.size + w2.size + b2.size
                          + w3.size + b3.size + batch)

    out = pl.pallas_call(
        critic_kernel,
        out_shape=jax.ShapeDtypeStruct((1, batch), jnp.float32),
        grid=grid,
        in_specs=[
            pl.BlockSpec((tb, n_state), lambda i: (i, 0)),       # x: batch-tiled
            resident(w1t.shape), resident(b1t.shape),            # weights: resident
            resident(w2t.shape), resident(b2t.shape),
            resident(w3t.shape),
            pl.BlockSpec(memory_space=pltpu.MemorySpace.SMEM),   # b3 scalar in SMEM
        ],
        out_specs=pl.BlockSpec((1, tb), lambda i: (0, i)),       # lane-dense value slab
        compiler_params=pltpu.CompilerParams(
            dimension_semantics=("parallel",)),
        cost_estimate=pl.CostEstimate(
            flops=flops, transcendentals=0, bytes_accessed=bytes_accessed),
    )(x, w1t, b1t, w2t, b2t, w3t, b3s)
    # (1, batch) -> (batch, 1): row-major layout-identical, no-copy reshape.
    return out.reshape(batch, 1)


def init_critic_params(key, number_of_state, hidden_size):
    """Deterministic synthetic init (PyTorch-Linear-like uniform fan-in scaling)."""
    ks = jax.random.split(key, 6)

    def lin(kw, kb, fan_in, fan_out):
        bound = 1.0 / jnp.sqrt(fan_in)
        w = jax.random.uniform(kw, (fan_in, fan_out), jnp.float32, -bound, bound)
        b = jax.random.uniform(kb, (1, fan_out), jnp.float32, -bound, bound)
        return w, b

    w1, b1 = lin(ks[0], ks[1], number_of_state, hidden_size)
    w2, b2 = lin(ks[2], ks[3], hidden_size, hidden_size)
    w3, b3 = lin(ks[4], ks[5], hidden_size, 1)
    return (w1, b1, w2, b2, w3, b3)


def critic_reference(x, params):
    """Pure-JAX reference of the same forward pass for a correctness check."""
    w1, b1, w2, b2, w3, b3 = params
    h1 = jnp.maximum(x @ w1 + b1, 0.0)
    h2 = jnp.maximum(h1 @ w2 + b2, 0.0)
    return h2 @ w3 + b3


if __name__ == "__main__":
    number_of_state = 8
    hidden_size = 32
    batch = 8

    key = jax.random.PRNGKey(0)
    key_x, key_p, key_x2, key_x3 = jax.random.split(key, 4)

    x = jax.random.normal(key_x, (batch, number_of_state), dtype=jnp.float32)
    params = init_critic_params(key_p, number_of_state, hidden_size)

    # Small-batch path (single block, grid of 1).
    out = critic_forward(x, params)
    out = jax.block_until_ready(out)
    ref = critic_reference(x, params)
    assert out.shape == (batch, 1), out.shape
    assert jnp.allclose(out, ref, atol=1e-5, rtol=1e-5), (
        f"mismatch: max abs err = {jnp.max(jnp.abs(out - ref))}"
    )

    # Multi-step batch grid (>= 2 steps), weights resident across steps.
    big_batch = 2176  # 17 * 128 -> tb = 1088, grid = 2
    xb = jax.random.normal(key_x2, (big_batch, number_of_state), dtype=jnp.float32)
    out_b = jax.block_until_ready(critic_forward(xb, params))
    ref_b = critic_reference(xb, params)
    assert out_b.shape == (big_batch, 1), out_b.shape
    assert jnp.allclose(out_b, ref_b, atol=1e-5, rtol=1e-5), (
        f"tiled mismatch: max abs err = {jnp.max(jnp.abs(out_b - ref_b))}"
    )

    # Ragged final tile (batch not a multiple of tb) -> relies on Pallas OOB masking;
    # each output lane depends only on its own batch column, so padding cannot leak.
    rag_batch = 1300
    xr = jax.random.normal(key_x3, (rag_batch, number_of_state), dtype=jnp.float32)
    out_r = jax.block_until_ready(critic_forward(xr, params))
    ref_r = critic_reference(xr, params)
    assert out_r.shape == (rag_batch, 1), out_r.shape
    assert jnp.allclose(out_r, ref_r, atol=1e-5, rtol=1e-5), (
        f"ragged mismatch: max abs err = {jnp.max(jnp.abs(out_r - ref_r))}"
    )

    print("KERNEL_OK")
</pallas_src>

<mosaic_0001>
module attributes {stable_mosaic.version = 11 : i64} {
  func.func @critic_kernel(%arg0: i32, %arg1: memref<8x8xf32, #tpu.memory_space<vmem>>, %arg2: memref<32x8xf32, #tpu.memory_space<vmem>>, %arg3: memref<32x1xf32, #tpu.memory_space<vmem>>, %arg4: memref<32x32xf32, #tpu.memory_space<vmem>>, %arg5: memref<32x1xf32, #tpu.memory_space<vmem>>, %arg6: memref<1x32xf32, #tpu.memory_space<vmem>>, %arg7: memref<1xf32, #tpu.memory_space<smem>>, %arg8: memref<1x8xf32, #tpu.memory_space<vmem>>) attributes {dimension_semantics = [#tpu.dimension_semantics<parallel>], iteration_bounds = array<i64: 1>, scalar_prefetch = 0 : i64, scratch_operands = 0 : i64, tpu.core_type = #tpu.core_type<tc>, window_params = [{transform_indices = @transform_0, window_bounds = array<i64: 8, 8>}, {pipeline_mode = #tpu.pipeline_mode<synchronous>, transform_indices = @transform_1, window_bounds = array<i64: 32, 8>}, {pipeline_mode = #tpu.pipeline_mode<synchronous>, transform_indices = @transform_2, window_bounds = array<i64: 32, 1>}, {pipeline_mode = #tpu.pipeline_mode<synchronous>, transform_indices = @transform_3, window_bounds = array<i64: 32, 32>}, {pipeline_mode = #tpu.pipeline_mode<synchronous>, transform_indices = @transform_4, window_bounds = array<i64: 32, 1>}, {pipeline_mode = #tpu.pipeline_mode<synchronous>, transform_indices = @transform_5, window_bounds = array<i64: 1, 32>}, {transform_indices = @transform_6, window_bounds = array<i64: 1>}, {transform_indices = @transform_7, window_bounds = array<i64: 1, 8>}]} {
    %c0 = arith.constant 0 : index
    %c0_0 = arith.constant 0 : index
    %0 = vector.load %arg2[%c0, %c0_0] : memref<32x8xf32, #tpu.memory_space<vmem>>, vector<32x8xf32>
    %c0_1 = arith.constant 0 : index
    %c0_2 = arith.constant 0 : index
    %1 = vector.load %arg1[%c0_1, %c0_2] : memref<8x8xf32, #tpu.memory_space<vmem>>, vector<8x8xf32>
    %cst = arith.constant dense<0.000000e+00> : vector<32x8xf32>
    %2 = tpu.matmul %0, %1, %cst {dimension_numbers = #tpu.dot_dimension_numbers<[1], [1], [0], [0], [0, 0, 1, 0], [], []>} : vector<32x8xf32>, vector<8x8xf32>, vector<32x8xf32> -> vector<32x8xf32>
    %c0_3 = arith.constant 0 : index
    %c0_4 = arith.constant 0 : index
    %3 = vector.load %arg3[%c0_3, %c0_4] : memref<32x1xf32, #tpu.memory_space<vmem>>, vector<32x1xf32>
    %4 = vector.broadcast %3 : vector<32x1xf32> to vector<32x8xf32>
    %5 = arith.addf %2, %4 : vector<32x8xf32>
    %cst_5 = arith.constant 0.000000e+00 : f32
    %6 = vector.broadcast %cst_5 : f32 to vector<32x8xf32>
    %7 = arith.maximumf %5, %6 : vector<32x8xf32>
    %c0_6 = arith.constant 0 : index
    %c0_7 = arith.constant 0 : index
    %8 = vector.load %arg4[%c0_6, %c0_7] : memref<32x32xf32, #tpu.memory_space<vmem>>, vector<32x32xf32>
    %cst_8 = arith.constant dense<0.000000e+00> : vector<32x8xf32>
    %9 = tpu.matmul %8, %7, %cst_8 {dimension_numbers = #tpu.dot_dimension_numbers<[1], [0], [0], [1], [0, 0, 1, 1], [], []>} : vector<32x32xf32>, vector<32x8xf32>, vector<32x8xf32> -> vector<32x8xf32>
    %c0_9 = arith.constant 0 : index
    %c0_10 = arith.constant 0 : index
    %10 = vector.load %arg5[%c0_9, %c0_10] : memref<32x1xf32, #tpu.memory_space<vmem>>, vector<32x1xf32>
    %11 = vector.broadcast %10 : vector<32x1xf32> to vector<32x8xf32>
    %12 = arith.addf %9, %11 : vector<32x8xf32>
    %cst_11 = arith.constant 0.000000e+00 : f32
    %13 = vector.broadcast %cst_11 : f32 to vector<32x8xf32>
    %14 = arith.maximumf %12, %13 : vector<32x8xf32>
    %c0_12 = arith.constant 0 : index
    %c0_13 = arith.constant 0 : index
    %15 = vector.load %arg6[%c0_12, %c0_13] : memref<1x32xf32, #tpu.memory_space<vmem>>, vector<1x32xf32>
    %cst_14 = arith.constant dense<0.000000e+00> : vector<1x8xf32>
    %16 = tpu.matmul %15, %14, %cst_14 {dimension_numbers = #tpu.dot_dimension_numbers<[1], [0], [0], [1], [0, 0, 1, 1], [], []>} : vector<1x32xf32>, vector<32x8xf32>, vector<1x8xf32> -> vector<1x8xf32>
    %c0_15 = arith.constant 0 : index
    %17 = memref.load %arg7[%c0_15] : memref<1xf32, #tpu.memory_space<smem>>
    %18 = vector.broadcast %17 : f32 to vector<1x8xf32>
    %19 = arith.addf %16, %18 : vector<1x8xf32>
    %c0_16 = arith.constant 0 : index
    %c0_17 = arith.constant 0 : index
    %20 = vector.load %arg8[%c0_16, %c0_17] : memref<1x8xf32, #tpu.memory_space<vmem>>, vector<1x8xf32>
    tpu.vector_store %arg8[%c0_16, %c0_17], %19 {strides = array<i32>} : memref<1x8xf32, #tpu.memory_space<vmem>>, vector<1x8xf32>,
    return
  }
  func.func @transform_0(%arg0: i32) -> (i32, i32) {
    %c0_i32 = arith.constant 0 : i32
    %c0_i32_0 = arith.constant 0 : i32
    return %arg0, %c0_i32 : i32, i32
  }
  func.func @transform_1(%arg0: i32) -> (i32, i32) {
    %c0_i32 = arith.constant 0 : i32
    %c0_i32_0 = arith.constant 0 : i32
    %c0_i32_1 = arith.constant 0 : i32
    return %c0_i32, %c0_i32_0 : i32, i32
  }
  func.func @transform_2(%arg0: i32) -> (i32, i32) {
    %c0_i32 = arith.constant 0 : i32
    %c0_i32_0 = arith.constant 0 : i32
    %c0_i32_1 = arith.constant 0 : i32
    return %c0_i32, %c0_i32_0 : i32, i32
  }
  func.func @transform_3(%arg0: i32) -> (i32, i32) {
    %c0_i32 = arith.constant 0 : i32
    %c0_i32_0 = arith.constant 0 : i32
    %c0_i32_1 = arith.constant 0 : i32
    return %c0_i32, %c0_i32_0 : i32, i32
  }
  func.func @transform_4(%arg0: i32) -> (i32, i32) {
    %c0_i32 = arith.constant 0 : i32
    %c0_i32_0 = arith.constant 0 : i32
    %c0_i32_1 = arith.constant 0 : i32
    return %c0_i32, %c0_i32_0 : i32, i32
  }
  func.func @transform_5(%arg0: i32) -> (i32, i32) {
    %c0_i32 = arith.constant 0 : i32
    %c0_i32_0 = arith.constant 0 : i32
    %c0_i32_1 = arith.constant 0 : i32
    return %c0_i32, %c0_i32_0 : i32, i32
  }
  func.func @transform_6(%arg0: i32) -> i32 {
    %c0_i32 = arith.constant 0 : i32
    %c0_i32_0 = arith.constant 0 : i32
    return %c0_i32 : i32
  }
  func.func @transform_7(%arg0: i32) -> (i32, i32) {
    %c0_i32 = arith.constant 0 : i32
    %c0_i32_0 = arith.constant 0 : i32
    return %c0_i32, %arg0 : i32, i32
  }
}

</mosaic_0001>

<bundles_post_ra>
// kernel: tpu_custom_call.1
= control target key start
LH: loop header
LB: loop body
LE: loop exit
PB: predicated region body
PF: predicated region fallthrough
CT: control target
= control target key end

     0   :  { %vm57_vm0 = vcmask 64512   ;;  %v473_v4 = vmov 0   ;;  %s588_s0 = inlined_call_operand.vmem [shape: f32[8,8], index: 0, kind: input, shape index: {}]   ;;  %s589_s1 = inlined_call_operand.vmem [shape: f32[32,8], index: 1, kind: input, shape index: {}]   ;;  %s590_s2 = inlined_call_operand.vmem [shape: f32[32,1], index: 2, kind: input, shape index: {}]   ;;  %s591_s3 = inlined_call_operand.vmem [shape: f32[32,32], index: 3, kind: input, shape index: {}]   ;;  %s592_s4 = inlined_call_operand.vmem [shape: f32[32,1], index: 4, kind: input, shape index: {}]   ;;  %s593_s5 = inlined_call_operand.vmem [shape: f32[1,32], index: 5, kind: input, shape index: {}]   ;;  %s594_s6 = inlined_call_operand.<no memory space> [shape: f32[1], index: 6, kind: input, shape index: {}]   ;;  %s595_s7 = inlined_call_operand.hbm [shape: f32[1,8], index: 7, kind: output, shape index: {}]  }
   0x1   :  { %v32_v0 = vld [vmem:[%s588_s0] sm:$0xff]  ;;  %v36_v2 = vld [vmem:[%s590_s2 + $0x18] sm:$0xff]  ;;  %v29_v3 = vld [vmem:[%s589_s1 + $0x8] sm:$0xff]  ;;  %449 = vset.pattern.permute.xlu0 %v473_v4  ;;  %450 = vset.pattern.permute.xlu1 %v473_v4 }
   0x2   :  { %v28_v1 = vld [vmem:[%s589_s1] sm:$0xff]  ;;  %412 = vmatprep.subr.msk.mxu0 %vm57_vm0, %v32_v0  ;;  %v34_v5 = vld [vmem:[%s590_s2 + $0x8] sm:$0xff]  ;;  %v30_v6 = vld [vmem:[%s589_s1 + $0x10] sm:$0xff]  ;;  %54 = vperm.xlu0 %449, %v36_v2  }
   0x3   :  { %414 = vmatprep.mubr.msk.f32.mxu0 %vm57_vm0, %v28_v1  ;;  %413 = vmatpush3.xpose.msk.msra.mxu0 %vm57_vm0, %v32_v0  ;;  %v35_v7 = vld [vmem:[%s590_s2 + $0x10] sm:$0xff] }
   0x4   :  { %44 = vperm.xlu1 %450, %v34_v5  }
   0x5   :  { %13 = vsyncpa [#allocation4], 0  ;;  %v33_v8 = vld [vmem:[%s590_s2] sm:$0xff]  ;;  %v31_v9 = vld [vmem:[%s589_s1 + $0x18] sm:$0xff]  ;;  %vm190_vm1 = vcmask 261120   ;;  %v474_v34 = vmov 0.0   ;;  %v294_v52 = vstv %s594_s6 }
   0x6   :  { %415 = vmatmul.mubr.msk.f32.vlgmr.msra.gmra.mxu0 %vm57_vm0, %v29_v3  ;;  %49 = vperm.xlu0 %449, %v35_v7   ;;  %v169_v10 = vld [vmem:[%s592_s4 + $0x18] sm:$0xff]  ;;  %v168_v11 = vld [vmem:[%s592_s4 + $0x10] sm:$0xff]  ;;  %v167_v12 = vld [vmem:[%s592_s4 + $0x8] sm:$0xff]  ;;  %vm475_vm2 = vmmov 0   ;;  %s476_s10 = smov [#allocation3]   ;;  %vm368_vm3 = vcmask 57344  }
   0x7   :  { %417 = vmatprep.mubr.msk.f32.mxu0 %vm57_vm0, %v30_v6  ;;  %v166_v13 = vld [vmem:[%s592_s4] sm:$0xff]  ;;  %v163_v31 = vld [vmem:[%s591_s3 + $0x8] sm:$0xff]  ;;  %v164_v32 = vld [vmem:[%s591_s3 + $0x10] sm:$0xff]  ;;  %434 = vmatprep.subr.mxu0 %v474_v34  ;;  %s376_s11 = sshll.u32 %s476_s10, 4  ;;  %s377_s11 = int_to_ptr.vmem [resolvable:$true] %s376_s11 }
   0x8   :  { %39 = vperm.xlu1 %450, %v33_v8   ;;  %v162_v14 = vld [vmem:[%s591_s3] sm:$0xff]  ;;  %v165_v33 = vld [vmem:[%s591_s3 + $0x18] sm:$0xff]  ;;  %s451_s12 = scalar_lea.vmem %s377_s11, 16  ;;  %s455_s13 = scalar_lea.vmem %s377_s11, 32 }
   0x9   :  { %428 = vmatprep.mubr.msk.f32.mxu1 %vm190_vm1, %v162_v14  ;;  %v292_v51 = vld [vmem:[%s593_s5] sm:$0x1]  ;;  %p452_p0 = scmp.ne.s32.totalorder %s377_s11, %s451_s12  ;;  %p456_p1 = scmp.lt.s32.totalorder %s377_s11, %s377_s11 }
   0xa   :  { %418 = vmatmul.mubr.msk.f32.gmra.mxu0 %vm57_vm0, %v31_v9  ;;  %187 = vperm.xlu0 %449, %v169_v10   ;;  %p457_p2 = scmp.lt.s32.totalorder %s455_s13, %s451_s12 }
   0xb   :  { %442 = vmatprep.mubr.msk.f32.mxu0 %vm475_vm2, %v474_v34 }
   0xc   :  { %182 = vperm.xlu1 %450, %v168_v11   ;;  %p458_p3 = por %p457_p2, %p456_p1 }
   0xe   :  { %177 = vperm.xlu0 %449, %v167_v12   ;;  %p459_p4 = pnand %p458_p3, %p452_p0 }
  0x10   :  { %172 = vperm.xlu1 %450, %v166_v13  }
  0x7d   :  { %v55_v15 = vpop.permute.xlu0 %54 }
  0x7f   :  { %v45_v17 = vpop.permute.xlu1 %44 }
  0x81   :  { %v50_v21 = vpop.permute.xlu0 %49 }
  0x83   :  { %v40_v26 = vpop.permute.xlu1 %39 }
  0x85   :  { %v188_v35 = vpop.permute.xlu0 %187 }
  0x87   :  { %v183_v37 = vpop.permute.xlu1 %182 }
  0x89   :  { %v178_v41 = vpop.permute.xlu0 %177 }
  0x8b   :  { %v173_v46 = vpop.permute.xlu1 %172 }
  0xc6   :  { %v416_v16 = vpop.f32.mrf.mxu0 }
  0xc7   :  { %v145_v23 = vadd.f32 %v416_v16, %v45_v17 }
  0xc8   :  { %v139_v18 = vpop.f32.mrf.mxu0 }
  0xc9   :  { %v140_v27 = vadd.f32 %v139_v18, %v40_v26  ;;  %v159_v29 = vmax.f32 %v145_v23, 0.0 }
  0xca   :  { %v419_v19 = vpop.f32.mrf.mxu0 }
  0xcb   :  { %v155_v20 = vadd.f32 %v419_v19, %v55_v15  ;;  %v158_v30 = vmax.f32 %v140_v27, 0.0 }
  0xcc   :  { %v149_v22 = vpop.f32.mrf.mxu0 }
  0xcd   :  { %v161_v24 = vmax.f32 %v155_v20, 0.0  ;;  %v150_v25 = vadd.f32 %v149_v22, %v50_v21 }
  0xcf   :  { %v160_v28 = vmax.f32 %v150_v25, 0.0  ;;  %420 = vmatprep.subr.mxu1 %v161_v24 }
  0xd0   :  { %421 = vmatpush3.msra.mxu1 %v161_v24 }
  0xd1   :  { %422 = vmatprep.subr.mxu1 %v160_v28 }
  0xd2   :  { %423 = vmatpush3.msra.mxu1 %v160_v28 }
  0xd3   :  { %424 = vmatprep.subr.mxu1 %v159_v29 }
  0xd4   :  { %425 = vmatpush3.msra.mxu1 %v159_v29 }
  0xd5   :  { %426 = vmatprep.subr.mxu1 %v158_v30 }
  0xd6   :  { %427 = vmatpush3.msra.mxu1 %v158_v30 }
  0xd7   :  { %429 = vmatmul.mubr.msk.f32.vlgmr.msra.gmra.mxu1 %vm190_vm1, %v163_v31 }
  0xd8   :  { %431 = vmatprep.mubr.msk.f32.mxu1 %vm190_vm1, %v164_v32 }
  0xdb   :  { %432 = vmatmul.mubr.msk.f32.gmra.mxu1 %vm190_vm1, %v165_v33 }
 0x197   :  { %v430_v36 = vpop.f32.mrf.mxu1 }
 0x198   :  { %v275_v43 = vadd.f32 %v430_v36, %v178_v41 }
 0x199   :  { %v269_v38 = vpop.f32.mrf.mxu1 }
 0x19a   :  { %v270_v47 = vadd.f32 %v269_v38, %v173_v46  ;;  %v289_v49 = vmax.f32 %v275_v43, 0.0 }
 0x19b   :  { %v433_v39 = vpop.f32.mrf.mxu1 }
 0x19c   :  { %v285_v40 = vadd.f32 %v433_v39, %v188_v35  ;;  %v288_v50 = vmax.f32 %v270_v47, 0.0 }
 0x19d   :  { %v279_v42 = vpop.f32.mrf.mxu1 }
 0x19e   :  { %v291_v44 = vmax.f32 %v285_v40, 0.0  ;;  %v280_v45 = vadd.f32 %v279_v42, %v183_v37 }
 0x1a0   :  { %v290_v48 = vmax.f32 %v280_v45, 0.0  ;;  %435 = vmatpush3.msra.mxu0 %v291_v44 }
 0x1a1   :  { %436 = vmatprep.subr.mxu0 %v474_v34 }
 0x1a2   :  { %437 = vmatpush3.msra.mxu0 %v290_v48 }
 0x1a3   :  { %438 = vmatprep.subr.mxu0 %v474_v34 }
 0x1a4   :  { %439 = vmatpush3.msra.mxu0 %v289_v49 }
 0x1a5   :  { %440 = vmatprep.subr.mxu0 %v474_v34 }
 0x1a6   :  { %441 = vmatpush3.msra.mxu0 %v288_v50 }
 0x1a7   :  { %443 = vmatmul.mubr.msk.f32.vlgmr.msra.gmra.mxu0 %vm190_vm1, %v292_v51 }
 0x267   :  { %v364_v53 = vpop.f32.mrf.mxu0 }
 0x268   :  { %v365_v54 = vadd.f32 %v364_v53, %v294_v52 }
 0x269   :  { %v444_v55 = vpop.f32.mrf.mxu0 }
 0x26a   :  { %369 = vst.msk [vmem:[#allocation3] sm:$0x1] %vm368_vm3, %v365_v54 }
 0x26b   :  { %462 = shalt.err (!%p459_p4)
}
 0x26c   :  { %379 = dma.vmem_to_hbm [thread:$0]  %s377_s11, 16, %s595_s7, [#allocation4]  }
 0x26d   :  { %471 = dma.done.wait [#allocation4], 16  }
 0x26e   :  { %472 = vsyncadd [#allocation4], 4294967280 }
 0x26f   :  { %383 = vsyncpa [#allocation4], 1 }

</bundles_post_ra>
